<compile_context>
chip_gen: v6e
topology: v6e:2x2x1
jax: 0.10.0
libtpu: 0.0.40
codegen_flags: <defaults>
</compile_context>

<pallas_src>
import functools

import jax
import jax.numpy as jnp
from jax.experimental import pallas as pl
from jax.experimental.pallas import tpu as pltpu


def _round_up(x, m):
    return ((x + m - 1) // m) * m


# ------------------------------------------------------------------ kernel --
def _critic_kernel(x_ref, u_ref, w1x_ref, w1u_ref, b1_ref,
                   w2_ref, b2_ref, w3_ref, b3_ref, out_ref):
    # Compute dtype follows the (possibly bf16) weights; activations streamed
    # from HBM in their original dtype and cast in-kernel (no HBM round trip).
    cdt = w1x_ref.dtype

    # Layer 1: cat([x, u]) @ W1 == x @ W1[:sd] + u @ W1[sd:], f32 MXU accum,
    # f32 bias + ReLU on the VPU.
    h1 = (jnp.dot(x_ref[...].astype(cdt), w1x_ref[...],
                  preferred_element_type=jnp.float32)
          + jnp.dot(u_ref[...].astype(cdt), w1u_ref[...],
                    preferred_element_type=jnp.float32)
          + b1_ref[...])
    h1 = jnp.maximum(h1, 0.0)

    # Layer 2: Linear + ReLU.
    h2 = jnp.dot(h1.astype(cdt), w2_ref[...],
                 preferred_element_type=jnp.float32) + b2_ref[...]
    h2 = jnp.maximum(h2, 0.0)

    # Layer 3: Linear, no activation.  Output written at its real width.
    q = jnp.dot(h2.astype(cdt), w3_ref[...],
                preferred_element_type=jnp.float32) + b3_ref[...]
    out_ref[...] = q.astype(out_ref.dtype)


# ------------------------------------------------------------ tile sizing --
_VMEM_LIMIT_BYTES = 32 * 1024 * 1024   # safe on v5e/v6e/v7x (<= physical)
_TILE_BUDGET_BYTES = 20 * 1024 * 1024  # activations/intermediates budget


def _pick_batch_tile(B, per_row_bytes, batch_tile):
    cap = max(8, (_TILE_BUDGET_BYTES // max(per_row_bytes, 1)) // 8 * 8)
    tb = min(batch_tile, cap, _round_up(B, 8))
    return max(8, (tb // 8) * 8)


# ------------------------------------------------------- single critic fwd --
@functools.partial(jax.jit, static_argnames=("batch_tile",))
def critic_forward(x, u, params, *, batch_tile=8192):
    """x: [B, state_dim], u: [B, action_dim * n_agents] -> [B, action_dim]."""
    w1x, w1u, b1, w2, b2, w3, b3 = params
    B, sd = x.shape
    adm = u.shape[1]
    n1, n2, od = w1x.shape[1], w2.shape[1], w3.shape[1]

    in_bytes = jnp.dtype(x.dtype).itemsize
    # double-buffered x/u/out tiles + f32 h1/h2 intermediates, per row:
    per_row = 2 * (sd + adm) * in_bytes + 2 * od * 4 + (n1 + n2) * 4
    tb = _pick_batch_tile(B, per_row, batch_tile)
    bp = _round_up(B, tb)
    if bp != B:  # zero rows: results in padded rows are discarded below
        x = jnp.pad(x, ((0, bp - B), (0, 0)))
        u = jnp.pad(u, ((0, bp - B), (0, 0)))

    stream = lambda i: (i, 0)      # activations: one batch tile per grid step
    const = lambda i: (0, 0)       # weights/biases resident in VMEM

    out = pl.pallas_call(
        _critic_kernel,
        out_shape=jax.ShapeDtypeStruct((bp, od), jnp.float32),
        grid=(bp // tb,),
        in_specs=[
            pl.BlockSpec((tb, sd), stream),
            pl.BlockSpec((tb, adm), stream),
            pl.BlockSpec((sd, n1), const),
            pl.BlockSpec((adm, n1), const),
            pl.BlockSpec((1, n1), const),
            pl.BlockSpec((n1, n2), const),
            pl.BlockSpec((1, n2), const),
            pl.BlockSpec((n2, od), const),
            pl.BlockSpec((1, od), const),
        ],
        out_specs=pl.BlockSpec((tb, od), stream),
        compiler_params=pltpu.CompilerParams(
            dimension_semantics=("parallel",),
            vmem_limit_bytes=_VMEM_LIMIT_BYTES),
    )(x, u, w1x, w1u, b1, w2, b2, w3, b3)

    return out[:B] if bp != B else out


# -------------------------------------------------- fused n_agents critics --
@functools.partial(jax.jit, static_argnames=("batch_tile",))
def critic_forward_all_agents(x, u, stacked_params, *, batch_tile=8192):
    """All agents' critics in one pallas_call.

    stacked_params: each leaf has a leading agent axis A.
    x: [B, state_dim], u: [B, action_dim * n_agents] (shared global obs/joint
    action, as in MADDPG) -> [A, B, action_dim].
    """
    w1x, w1u, b1, w2, b2, w3, b3 = stacked_params
    A = w1x.shape[0]
    B, sd = x.shape
    adm = u.shape[1]
    n1, n2, od = w1x.shape[2], w2.shape[2], w3.shape[2]

    in_bytes = jnp.dtype(x.dtype).itemsize
    per_row = 2 * (sd + adm) * in_bytes + 2 * od * 4 + (n1 + n2) * 4
    tb = _pick_batch_tile(B, per_row, batch_tile)
    bp = _round_up(B, tb)
    if bp != B:
        x = jnp.pad(x, ((0, bp - B), (0, 0)))
        u = jnp.pad(u, ((0, bp - B), (0, 0)))

    stream = lambda a, i: (i, 0)        # shared activations (agent-invariant)
    agent = lambda a, i: (a, 0, 0)      # per-agent weights (agent dim squeezed)

    out = pl.pallas_call(
        _critic_kernel,
        out_shape=jax.ShapeDtypeStruct((A, bp, od), jnp.float32),
        grid=(A, bp // tb),
        in_specs=[
            pl.BlockSpec((tb, sd), stream),
            pl.BlockSpec((tb, adm), stream),
            pl.BlockSpec((None, sd, n1), agent),
            pl.BlockSpec((None, adm, n1), agent),
            pl.BlockSpec((None, 1, n1), agent),
            pl.BlockSpec((None, n1, n2), agent),
            pl.BlockSpec((None, 1, n2), agent),
            pl.BlockSpec((None, n2, od), agent),
            pl.BlockSpec((None, 1, od), agent),
        ],
        out_specs=pl.BlockSpec((None, tb, od), lambda a, i: (a, i, 0)),
        compiler_params=pltpu.CompilerParams(
            dimension_semantics=("parallel", "parallel"),
            vmem_limit_bytes=_VMEM_LIMIT_BYTES),
    )(x, u, w1x, w1u, b1, w2, b2, w3, b3)

    return out[:, :B] if bp != B else out


# -------------------------------------------------------------- parameters --
def init_critic_params(key, state_dim, action_dim, n_agents, hidden_layers):
    """PyTorch-style nn.Linear init.  Weights stored as [in, out] (= weight.T),
    biases as [1, out].  Layer-1 weight is split into its state / action row
    blocks so the kernel never needs a concatenated input."""
    nodes1, nodes2 = hidden_layers
    in1 = state_dim + action_dim * n_agents
    ks = jax.random.split(key, 6)

    def lin(kw, kb, fan_in, fan_out):
        bound = 1.0 / (fan_in ** 0.5)   # U(-1/sqrt(fan_in), 1/sqrt(fan_in))
        w = jax.random.uniform(kw, (fan_in, fan_out), jnp.float32, -bound, bound)
        b = jax.random.uniform(kb, (1, fan_out), jnp.float32, -bound, bound)
        return w, b

    w1, b1 = lin(ks[0], ks[1], in1, nodes1)
    w2, b2 = lin(ks[2], ks[3], nodes1, nodes2)
    w3, b3 = lin(ks[4], ks[5], nodes2, action_dim)
    w1x, w1u = w1[:state_dim], w1[state_dim:]
    return (w1x, w1u, b1, w2, b2, w3, b3)


def cast_params(params, dtype):
    """Persist weight matrices in `dtype` (e.g. bf16) once; biases stay f32
    on purpose — they are added to the f32 MXU accumulator."""
    w1x, w1u, b1, w2, b2, w3, b3 = params
    return (w1x.astype(dtype), w1u.astype(dtype), b1,
            w2.astype(dtype), b2, w3.astype(dtype), b3)


def stack_agent_params(per_agent_params):
    """[(p0...), (p1...), ...] -> one tuple with a leading agent axis."""
    return tuple(jnp.stack(leaves) for leaves in zip(*per_agent_params))


# --------------------------------------------------------------- reference --
def critic_reference(x, u, params):
    w1x, w1u, b1, w2, b2, w3, b3 = params
    f32 = lambda a: a.astype(jnp.float32)
    h = jnp.maximum(x @ f32(w1x) + u @ f32(w1u) + b1, 0.0)
    h = jnp.maximum(h @ f32(w2) + b2, 0.0)
    return h @ f32(w3) + b3


# --------------------------------------------------------------------- demo --
if __name__ == "__main__":
    batch = 8
    state_dim = 16
    action_dim = 4
    n_agents = 3
    hidden_layers_critic = (32, 32)

    key = jax.random.PRNGKey(0)
    kx, ku, kp = jax.random.split(key, 3)

    x = jax.random.normal(kx, (batch, state_dim), jnp.float32)
    u = jax.random.normal(ku, (batch, action_dim * n_agents), jnp.float32)

    # --- single critic, f32 weights: tight correctness check -----------------
    params = init_critic_params(kp, state_dim, action_dim, n_agents,
                                hidden_layers_critic)
    out = jax.block_until_ready(critic_forward(x, u, params))
    ref = critic_reference(x, u, params)
    assert out.shape == (batch, action_dim)
    assert jnp.allclose(out, ref, atol=1e-5, rtol=1e-5)

    # --- single critic, bf16 weights (perf path): loose check ----------------
    params_bf16 = cast_params(params, jnp.bfloat16)
    out_bf16 = jax.block_until_ready(critic_forward(x, u, params_bf16))
    assert out_bf16.shape == (batch, action_dim)
    assert jnp.allclose(out_bf16, ref, atol=1e-1, rtol=1e-1)

    # --- all n_agents critics fused into one pallas_call ---------------------
    agent_keys = jax.random.split(jax.random.PRNGKey(1), n_agents)
    per_agent = [init_critic_params(k, state_dim, action_dim, n_agents,
                                    hidden_layers_critic) for k in agent_keys]
    stacked = stack_agent_params(per_agent)
    out_all = jax.block_until_ready(critic_forward_all_agents(x, u, stacked))
    assert out_all.shape == (n_agents, batch, action_dim)
    for a in range(n_agents):
        ref_a = critic_reference(x, u, per_agent[a])
        assert jnp.allclose(out_all[a], ref_a, atol=1e-5, rtol=1e-5)

    print("KERNEL_OK")
</pallas_src>

<mosaic_0001>
module attributes {stable_mosaic.version = 11 : i64} {
  func.func @_critic_kernel(%arg0: i32, %arg1: memref<8x16xf32, #tpu.memory_space<vmem>>, %arg2: memref<8x12xf32, #tpu.memory_space<vmem>>, %arg3: memref<16x32xf32, #tpu.memory_space<vmem>>, %arg4: memref<12x32xf32, #tpu.memory_space<vmem>>, %arg5: memref<1x32xf32, #tpu.memory_space<vmem>>, %arg6: memref<32x32xf32, #tpu.memory_space<vmem>>, %arg7: memref<1x32xf32, #tpu.memory_space<vmem>>, %arg8: memref<32x4xf32, #tpu.memory_space<vmem>>, %arg9: memref<1x4xf32, #tpu.memory_space<vmem>>, %arg10: memref<8x4xf32, #tpu.memory_space<vmem>>) attributes {dimension_semantics = [#tpu.dimension_semantics<parallel>], iteration_bounds = array<i64: 1>, scalar_prefetch = 0 : i64, scratch_operands = 0 : i64, tpu.core_type = #tpu.core_type<tc>, window_params = [{transform_indices = @transform_0, window_bounds = array<i64: 8, 16>}, {transform_indices = @transform_1, window_bounds = array<i64: 8, 12>}, {pipeline_mode = #tpu.pipeline_mode<synchronous>, transform_indices = @transform_2, window_bounds = array<i64: 16, 32>}, {pipeline_mode = #tpu.pipeline_mode<synchronous>, transform_indices = @transform_3, window_bounds = array<i64: 12, 32>}, {pipeline_mode = #tpu.pipeline_mode<synchronous>, transform_indices = @transform_4, window_bounds = array<i64: 1, 32>}, {pipeline_mode = #tpu.pipeline_mode<synchronous>, transform_indices = @transform_5, window_bounds = array<i64: 32, 32>}, {pipeline_mode = #tpu.pipeline_mode<synchronous>, transform_indices = @transform_6, window_bounds = array<i64: 1, 32>}, {pipeline_mode = #tpu.pipeline_mode<synchronous>, transform_indices = @transform_7, window_bounds = array<i64: 32, 4>}, {pipeline_mode = #tpu.pipeline_mode<synchronous>, transform_indices = @transform_8, window_bounds = array<i64: 1, 4>}, {transform_indices = @transform_9, window_bounds = array<i64: 8, 4>}]} {
    %c0 = arith.constant 0 : index
    %c0_0 = arith.constant 0 : index
    %0 = vector.load %arg1[%c0, %c0_0] : memref<8x16xf32, #tpu.memory_space<vmem>>, vector<8x16xf32>
    %c0_1 = arith.constant 0 : index
    %c0_2 = arith.constant 0 : index
    %1 = vector.load %arg3[%c0_1, %c0_2] : memref<16x32xf32, #tpu.memory_space<vmem>>, vector<16x32xf32>
    %cst = arith.constant dense<0.000000e+00> : vector<8x32xf32>
    %2 = tpu.matmul %0, %1, %cst {dimension_numbers = #tpu.dot_dimension_numbers<[1], [0], [0], [1], [0, 0, 1, 1], [], []>} : vector<8x16xf32>, vector<16x32xf32>, vector<8x32xf32> -> vector<8x32xf32>
    %c0_3 = arith.constant 0 : index
    %c0_4 = arith.constant 0 : index
    %3 = vector.load %arg2[%c0_3, %c0_4] : memref<8x12xf32, #tpu.memory_space<vmem>>, vector<8x12xf32>
    %c0_5 = arith.constant 0 : index
    %c0_6 = arith.constant 0 : index
    %4 = vector.load %arg4[%c0_5, %c0_6] : memref<12x32xf32, #tpu.memory_space<vmem>>, vector<12x32xf32>
    %cst_7 = arith.constant dense<0.000000e+00> : vector<8x32xf32>
    %5 = tpu.matmul %3, %4, %cst_7 {dimension_numbers = #tpu.dot_dimension_numbers<[1], [0], [0], [1], [0, 0, 1, 1], [], []>} : vector<8x12xf32>, vector<12x32xf32>, vector<8x32xf32> -> vector<8x32xf32>
    %6 = arith.addf %2, %5 : vector<8x32xf32>
    %c0_8 = arith.constant 0 : index
    %c0_9 = arith.constant 0 : index
    %7 = vector.load %arg5[%c0_8, %c0_9] : memref<1x32xf32, #tpu.memory_space<vmem>>, vector<1x32xf32>
    %8 = vector.broadcast %7 : vector<1x32xf32> to vector<8x32xf32>
    %9 = arith.addf %6, %8 : vector<8x32xf32>
    %cst_10 = arith.constant 0.000000e+00 : f32
    %10 = vector.broadcast %cst_10 : f32 to vector<8x32xf32>
    %11 = arith.maximumf %9, %10 : vector<8x32xf32>
    %c0_11 = arith.constant 0 : index
    %c0_12 = arith.constant 0 : index
    %12 = vector.load %arg6[%c0_11, %c0_12] : memref<32x32xf32, #tpu.memory_space<vmem>>, vector<32x32xf32>
    %cst_13 = arith.constant dense<0.000000e+00> : vector<8x32xf32>
    %13 = tpu.matmul %11, %12, %cst_13 {dimension_numbers = #tpu.dot_dimension_numbers<[1], [0], [0], [1], [0, 0, 1, 1], [], []>} : vector<8x32xf32>, vector<32x32xf32>, vector<8x32xf32> -> vector<8x32xf32>
    %c0_14 = arith.constant 0 : index
    %c0_15 = arith.constant 0 : index
    %14 = vector.load %arg7[%c0_14, %c0_15] : memref<1x32xf32, #tpu.memory_space<vmem>>, vector<1x32xf32>
    %15 = vector.broadcast %14 : vector<1x32xf32> to vector<8x32xf32>
    %16 = arith.addf %13, %15 : vector<8x32xf32>
    %cst_16 = arith.constant 0.000000e+00 : f32
    %17 = vector.broadcast %cst_16 : f32 to vector<8x32xf32>
    %18 = arith.maximumf %16, %17 : vector<8x32xf32>
    %c0_17 = arith.constant 0 : index
    %c0_18 = arith.constant 0 : index
    %19 = vector.load %arg8[%c0_17, %c0_18] : memref<32x4xf32, #tpu.memory_space<vmem>>, vector<32x4xf32>
    %cst_19 = arith.constant dense<0.000000e+00> : vector<8x4xf32>
    %20 = tpu.matmul %18, %19, %cst_19 {dimension_numbers = #tpu.dot_dimension_numbers<[1], [0], [0], [1], [0, 0, 1, 1], [], []>} : vector<8x32xf32>, vector<32x4xf32>, vector<8x4xf32> -> vector<8x4xf32>
    %c0_20 = arith.constant 0 : index
    %c0_21 = arith.constant 0 : index
    %21 = vector.load %arg9[%c0_20, %c0_21] : memref<1x4xf32, #tpu.memory_space<vmem>>, vector<1x4xf32>
    %22 = vector.broadcast %21 : vector<1x4xf32> to vector<8x4xf32>
    %23 = arith.addf %20, %22 : vector<8x4xf32>
    %c0_22 = arith.constant 0 : index
    %c0_23 = arith.constant 0 : index
    %24 = vector.load %arg10[%c0_22, %c0_23] : memref<8x4xf32, #tpu.memory_space<vmem>>, vector<8x4xf32>
    tpu.vector_store %arg10[%c0_22, %c0_23], %23 {strides = array<i32>} : memref<8x4xf32, #tpu.memory_space<vmem>>, vector<8x4xf32>,
    return
  }
  func.func @transform_0(%arg0: i32) -> (i32, i32) {
    %c0_i32 = arith.constant 0 : i32
    %c0_i32_0 = arith.constant 0 : i32
    return %arg0, %c0_i32 : i32, i32
  }
  func.func @transform_1(%arg0: i32) -> (i32, i32) {
    %c0_i32 = arith.constant 0 : i32
    %c0_i32_0 = arith.constant 0 : i32
    return %arg0, %c0_i32 : i32, i32
  }
  func.func @transform_2(%arg0: i32) -> (i32, i32) {
    %c0_i32 = arith.constant 0 : i32
    %c0_i32_0 = arith.constant 0 : i32
    %c0_i32_1 = arith.constant 0 : i32
    return %c0_i32, %c0_i32_0 : i32, i32
  }
  func.func @transform_3(%arg0: i32) -> (i32, i32) {
    %c0_i32 = arith.constant 0 : i32
    %c0_i32_0 = arith.constant 0 : i32
    %c0_i32_1 = arith.constant 0 : i32
    return %c0_i32, %c0_i32_0 : i32, i32
  }
  func.func @transform_4(%arg0: i32) -> (i32, i32) {
    %c0_i32 = arith.constant 0 : i32
    %c0_i32_0 = arith.constant 0 : i32
    %c0_i32_1 = arith.constant 0 : i32
    return %c0_i32, %c0_i32_0 : i32, i32
  }
  func.func @transform_5(%arg0: i32) -> (i32, i32) {
    %c0_i32 = arith.constant 0 : i32
    %c0_i32_0 = arith.constant 0 : i32
    %c0_i32_1 = arith.constant 0 : i32
    return %c0_i32, %c0_i32_0 : i32, i32
  }
  func.func @transform_6(%arg0: i32) -> (i32, i32) {
    %c0_i32 = arith.constant 0 : i32
    %c0_i32_0 = arith.constant 0 : i32
    %c0_i32_1 = arith.constant 0 : i32
    return %c0_i32, %c0_i32_0 : i32, i32
  }
  func.func @transform_7(%arg0: i32) -> (i32, i32) {
    %c0_i32 = arith.constant 0 : i32
    %c0_i32_0 = arith.constant 0 : i32
    %c0_i32_1 = arith.constant 0 : i32
    return %c0_i32, %c0_i32_0 : i32, i32
  }
  func.func @transform_8(%arg0: i32) -> (i32, i32) {
    %c0_i32 = arith.constant 0 : i32
    %c0_i32_0 = arith.constant 0 : i32
    %c0_i32_1 = arith.constant 0 : i32
    return %c0_i32, %c0_i32_0 : i32, i32
  }
  func.func @transform_9(%arg0: i32) -> (i32, i32) {
    %c0_i32 = arith.constant 0 : i32
    %c0_i32_0 = arith.constant 0 : i32
    return %arg0, %c0_i32 : i32, i32
  }
}

</mosaic_0001>

<bundles_post_ra>
// kernel: critic_forward.1
= control target key start
LH: loop header
LB: loop body
LE: loop exit
PB: predicated region body
PF: predicated region fallthrough
CT: control target
= control target key end

     0   :  { %14 = vsyncpa [#allocation3], 0  ;;  %s658_s0 = inlined_call_operand.vmem [shape: f32[8,16], index: 0, kind: input, shape index: {}]   ;;  %s659_s1 = inlined_call_operand.hbm [shape: f32[8,12], index: 1, kind: input, shape index: {}]   ;;  %s660_s2 = inlined_call_operand.hbm [shape: f32[16,32], index: 2, kind: input, shape index: {}]   ;;  %s661_s3 = inlined_call_operand.hbm [shape: f32[12,32], index: 3, kind: input, shape index: {}]   ;;  %s662_s4 = inlined_call_operand.vmem [shape: f32[1,32], index: 4, kind: input, shape index: {}]   ;;  %s663_s5 = inlined_call_operand.vmem [shape: f32[32,32], index: 5, kind: input, shape index: {}]   ;;  %s664_s6 = inlined_call_operand.vmem [shape: f32[1,32], index: 6, kind: input, shape index: {}]   ;;  %s665_s7 = inlined_call_operand.vmem [shape: f32[32,4], index: 7, kind: input, shape index: {}]   ;;  %s666_s8 = inlined_call_operand.vmem [shape: f32[1,4], index: 8, kind: input, shape index: {}]   ;;  %s667_s9 = inlined_call_operand.vmem [shape: f32[8,4], index: 9, kind: output, shape index: {}]  }
   0x1   :  { %15 = vsyncpa [#allocation5], 0  ;;  %s547_s30 = smov [#allocation4]  }
   0x2   :  { %s33_s10 = sshll.u32 %s547_s30, 4  ;;  %s34_s10 = int_to_ptr.vmem [resolvable:$true] %s33_s10 }
   0x3   :  { %s491_s11 = scalar_lea.vmem %s34_s10, 256  ;;  %p496_p1 = scmp.lt.s32.totalorder %s34_s10, %s34_s10 }
   0x4   :  { %p492_p0 = scmp.ne.s32.totalorder %s34_s10, %s491_s11  ;;  %p497_p2 = scmp.lt.s32.totalorder %s491_s11, %s491_s11 }
   0x6   :  { %p498_p3 = por %p497_p2, %p496_p1 }
   0x8   :  { %p499_p4 = pnand %p498_p3, %p492_p0 }
   0xa   :  { %502 = shalt.err (!%p499_p4)
}
   0xb   :  { %s548_s12 = smov 128   ;;  %s549_s13 = smov 8  }
   0xc   :  { %39 = dma.hbm_to_vmem [thread:$0]  %s660_s2, 256, %s34_s10, [#allocation5], %s548_s12, %s548_s12, %s549_s13  }
   0xd   :  { %s550_s16 = smov [#allocation2]   ;;  %s551_s18 = smov [#allocation6]  }
   0xe   :  { %s24_s17 = sshll.u32 %s550_s16, 4  ;;  %s45_s19 = sshll.u32 %s551_s18, 4  ;;  %s25_s17 = int_to_ptr.vmem [resolvable:$true] %s24_s17  ;;  %s46_s19 = int_to_ptr.vmem [resolvable:$true] %s45_s19 }
   0xf   :  { %s511_s20 = scalar_lea.vmem %s25_s17, 128  ;;  %p516_p6 = scmp.lt.s32.totalorder %s25_s17, %s25_s17 }
  0x10   :  { %p512_p5 = scmp.ne.s32.totalorder %s25_s17, %s511_s20  ;;  %p517_p7 = scmp.lt.s32.totalorder %s511_s20, %s511_s20 }
  0x12   :  { %p518_p8 = por %p517_p7, %p516_p6 }
  0x14   :  { %p519_p9 = pnand %p518_p8, %p512_p5 }
  0x16   :  { %522 = shalt.err (!%p519_p9)
}
  0x17   :  { %27 = dma.hbm_to_vmem [thread:$0]  %s659_s1, 128, %s25_s17, [#allocation3]  }
  0x18   :  { %s531_s23 = scalar_lea.vmem %s46_s19, 256  ;;  %p536_p11 = scmp.lt.s32.totalorder %s46_s19, %s46_s19 }
  0x19   :  { %p532_p10 = scmp.ne.s32.totalorder %s46_s19, %s531_s23  ;;  %p537_p12 = scmp.lt.s32.totalorder %s531_s23, %s531_s23 }
  0x1b   :  { %p538_p13 = por %p537_p12, %p536_p11 }
  0x1d   :  { %p539_p0 = pnand %p538_p13, %p532_p10 }
  0x1f   :  { %542 = shalt.err (!%p539_p0)
}
  0x20   :  { %51 = dma.hbm_to_vmem [thread:$0]  %s661_s3, 256, %s46_s19, [#allocation5], %s548_s12, %s548_s12, %s549_s13  }
  0x21   :  { %543 = dma.done.wait [#allocation3], 128  }
  0x22   :  { %544 = vsyncadd [#allocation3], 4294967168 }
  0x23   :  { %545 = dma.done.wait [#allocation5], 512  }
  0x24   :  { %546 = vsyncadd [#allocation5], 4294966784  ;;  %v552_v0 = vmov 0.0   ;;  %vm553_vm0 = vmmov 0   ;;  %vm81_vm1 = vcmask 1043456   ;;  %v73_v2 = vld [vmem:[#allocation4 + $0x8] sm:$0xff] }
  0x25   :  { %440 = vmatprep.subr.mxu0 %v552_v0  ;;  %447 = vmatprep.subr.mxu1 %v552_v0  ;;  %v76_v1 = vld [vmem:[#allocation6 + $0x8] sm:$0xf]  ;;  %v75_v3 = vld [vmem:[#allocation6] sm:$0xff]  ;;  %v72_v4 = vld [vmem:[#allocation4] sm:$0xff]  ;;  %vm77_vm2 = vcmask 97280   ;;  %vm155_vm3 = vcmask 130048  }
  0x26   :  { %444 = vmatprep.mubr.msk.f32.mxu0 %vm553_vm0, %v552_v0  ;;  %451 = vmatprep.mubr.msk.f32.mxu1 %vm553_vm0, %v552_v0  ;;  %v74_v5 = vld [vmem:[#allocation2] sm:$0xff]  ;;  %v241_v7 = vld [vmem:[%s663_s5 + $0x18] sm:$0xff]  ;;  %v240_v8 = vld [vmem:[%s663_s5 + $0x10] sm:$0xff]  ;;  %vm249_vm4 = vcmask 261120   ;;  %vm408_vm5 = vcmask 31744  }
  0x27   :  { %441 = vmatpush3.msk.msra.mxu0 %vm81_vm1, %v76_v1  ;;  %448 = vmatpush3.msra.mxu1 %v73_v2  ;;  %v71_v6 = vld [vmem:[%s658_s0] sm:$0xff]  ;;  %v239_v9 = vld [vmem:[%s663_s5 + $0x8] sm:$0xff]  ;;  %v327_v11 = vld [vmem:[%s665_s7 + $0x18] sm:$0xff] }
  0x28   :  { %442 = vmatprep.subr.mxu0 %v552_v0  ;;  %449 = vmatprep.subr.mxu1 %v552_v0  ;;  %v238_v10 = vld [vmem:[%s663_s5] sm:$0xff]  ;;  %v326_v20 = vld [vmem:[%s665_s7 + $0x10] sm:$0xff]  ;;  %v325_v21 = vld [vmem:[%s665_s7 + $0x8] sm:$0xff] }
  0x29   :  { %443 = vmatpush3.msra.mxu0 %v75_v3  ;;  %450 = vmatpush3.msra.mxu1 %v72_v4  ;;  %v419_v14 = vld [vmem:[%s662_s4] ss:$0 sm:$0xff] }
  0x2a   :  { %445 = vmatmul.mubr.msk.f32.vlgmr.msra.gmra.mxu0 %vm77_vm2, %v74_v5  ;;  %452 = vmatmul.mubr.msk.f32.vlgmr.msra.gmra.mxu1 %vm155_vm3, %v71_v6  ;;  %v324_v22 = vld [vmem:[%s665_s7] sm:$0xff] }
  0x2b   :  { %454 = vmatprep.subr.mxu0 %v552_v0  ;;  %462 = vmatprep.mubr.msk.f32.mxu0 %vm553_vm0, %v552_v0  ;;  %v420_v23 = vld [vmem:[%s664_s6] ss:$0 sm:$0xff] }
  0x2c   :  { %465 = vmatprep.subr.mxu1 %v552_v0  ;;  %473 = vmatprep.mubr.msk.f32.mxu1 %vm553_vm0, %v552_v0  ;;  %v422_v28 = vld [vmem:[%s666_s8] ss:$0 sm:$0xff] }
  0x2d   :  { %455 = vmatpush3.msra.mxu0 %v241_v7  ;;  %466 = vmatpush3.msra.mxu1 %v327_v11 }
  0x2e   :  { %456 = vmatprep.subr.mxu0 %v552_v0  ;;  %467 = vmatprep.subr.mxu1 %v552_v0 }
  0x2f   :  { %457 = vmatpush3.msra.mxu0 %v240_v8  ;;  %468 = vmatpush3.msra.mxu1 %v326_v20 }
  0x30   :  { %458 = vmatprep.subr.mxu0 %v552_v0  ;;  %469 = vmatprep.subr.mxu1 %v552_v0 }
  0x31   :  { %459 = vmatpush3.msra.mxu0 %v239_v9  ;;  %470 = vmatpush3.msra.mxu1 %v325_v21 }
  0x32   :  { %460 = vmatprep.subr.mxu0 %v552_v0  ;;  %471 = vmatprep.subr.mxu1 %v552_v0 }
  0x33   :  { %461 = vmatpush3.msra.mxu0 %v238_v10  ;;  %472 = vmatpush3.msra.mxu1 %v324_v22 }
  0xea   :  { %v151_v12 = vpop.f32.mrf.mxu0  ;;  %v225_v13 = vpop.f32.mrf.mxu1 }
  0xeb   :  { %v226_v15 = vadd.f32 %v225_v13, %v151_v12 }
  0xec   :  { %v446_v16 = vpop.f32.mrf.mxu0  ;;  %v453_v17 = vpop.f32.mrf.mxu1 }
  0xed   :  { %v236_v18 = vadd.f32 %v419_v14, %v226_v15 }
  0xef   :  { %v237_v19 = vmax.f32 %v236_v18, 0.0 }
  0xf1   :  { %463 = vmatmul.mubr.msk.f32.vlgmr.msra.gmra.mxu0 %vm249_vm4, %v237_v19 }
 0x1b1   :  { %v319_v24 = vpop.f32.mrf.mxu0 }
 0x1b2   :  { %v320_v25 = vadd.f32 %v420_v23, %v319_v24 }
 0x1b3   :  { %v464_v26 = vpop.f32.mrf.mxu0 }
 0x1b4   :  { %v323_v27 = vmax.f32 %v320_v25, 0.0 }
 0x1b6   :  { %474 = vmatmul.mubr.msk.f32.vlgmr.msra.gmra.mxu1 %vm249_vm4, %v323_v27 }
 0x276   :  { %v404_v29 = vpop.f32.mrf.mxu1 }
 0x277   :  { %v405_v30 = vadd.f32 %v422_v28, %v404_v29 }
 0x278   :  { %v475_v31 = vpop.f32.mrf.mxu1 }
 0x279   :  { %409 = vst.msk [vmem:[%s667_s9] sm:$0xff] %vm408_vm5, %v405_v30 }
 0x27a   :  { %414 = vsyncpa [#allocation3], 1 }
 0x27b   :  { %415 = vsyncpa [#allocation5], 1 }

</bundles_post_ra>
